<compile_context>
chip_gen: v5e
topology: v5e:2x2
jax: 0.10.0
libtpu: 0.0.40
codegen_flags: <defaults>
</compile_context>

<pallas_src>
import functools

import jax
import jax.numpy as jnp
from jax.experimental import pallas as pl
from jax.experimental.pallas import tpu as pltpu


def _round_up(n: int, m: int) -> int:
    return ((n + m - 1) // m) * m


def _num_tensorcores() -> int:
    """Best-effort TensorCore-per-chip count (v7x = 2, earlier generations = 1)."""
    try:
        kind = jax.devices()[0].device_kind.lower()
        if "7" in kind:
            return 2
    except Exception:  # pragma: no cover - detection is a perf heuristic only
        pass
    return 1


def _choose_block_m(batch: int, num_tc: int) -> int:
    """Pick the batch tile.

    - v5e/v6e (1 TC): a single grid step for anything up to the cap (per-step overhead
      ~0.35 us dominates the tiny per-step DMA here, so splitting only hurts).
    - v7x (2 TCs): split the batch so both cores get an equal number of steps.
    - Large batches: 2048-row tiles (VMEM use stays <10 MiB, far under every chip's limit),
      block_m a multiple of 16 to keep bf16 vregs fully packed.
    """
    cap = 2048
    if batch <= cap:
        if num_tc >= 2 and batch >= 32:
            half = _round_up((batch + 1) // 2, 16)
            return min(half, batch)          # grid of 2 equal-ish tiles for the two TCs
        return batch                         # one grid step; no split on single-TC chips
    bm = cap
    if num_tc >= 2:
        n_tiles = pl.cdiv(batch, bm)
        if n_tiles % 2 == 1:                 # keep the grid length even on v7x
            bm = _round_up(pl.cdiv(batch, n_tiles + 1), 16)
    return bm


def mlp_kernel(x_ref, w1_ref, b1_ref, w2_ref, b2_ref, w3_ref, b3_ref,
               w4_ref, b4_ref, o_ref):
    """Fused 4-layer MLP: (Linear+ReLU) x3 -> Linear -> Sigmoid.

    MXU inputs are bf16 (x is cast in-kernel), accumulation is f32
    (preferred_element_type), and all post-matmul VPU/EUP math (bias add, ReLU,
    sigmoid) stays in f32 -- v5e has no bf16 VPU/EUP.  Intermediates never leave
    VMEM/vregs (no HBM traffic for h).
    """
    x = x_ref[...].astype(jnp.bfloat16)                                 # f32 -> bf16 in VMEM

    h = jnp.dot(x, w1_ref[...], preferred_element_type=jnp.float32) + b1_ref[...]
    h = jnp.maximum(h, 0.0).astype(jnp.bfloat16)                        # back to MXU dtype

    h = jnp.dot(h, w2_ref[...], preferred_element_type=jnp.float32) + b2_ref[...]
    h = jnp.maximum(h, 0.0).astype(jnp.bfloat16)

    h = jnp.dot(h, w3_ref[...], preferred_element_type=jnp.float32) + b3_ref[...]
    h = jnp.maximum(h, 0.0).astype(jnp.bfloat16)

    logits = jnp.dot(h, w4_ref[...], preferred_element_type=jnp.float32) + b4_ref[...]
    # Unpadded (block_m, D_out) store: tiny masked vst, negligible vs. the padded-f32
    # writeback it replaces (store slot is nowhere near saturated in this kernel).
    o_ref[...] = jax.nn.sigmoid(logits).astype(o_ref.dtype)


def prepare_params(params):
    """One-time (outside-jit) conversion: weights -> bf16, biases -> f32.

    Hoisting these casts keeps the jitted forward down to a single pallas_call,
    which matters in the small-batch latency-bound regime.
    """
    prepared = {}
    for idx in range(1, 5):
        prepared[f"w{idx}"] = params[f"w{idx}"].astype(jnp.bfloat16)
        prepared[f"b{idx}"] = params[f"b{idx}"].astype(jnp.float32)
    return prepared


@functools.partial(jax.jit, static_argnames=("block_m",))
def _forward(x, prepared, *, block_m):
    B, D_in = x.shape
    w1, b1 = prepared["w1"], prepared["b1"]
    w2, b2 = prepared["w2"], prepared["b2"]
    w3, b3 = prepared["w3"], prepared["b3"]
    w4, b4 = prepared["w4"], prepared["b4"]
    H1, H2, H3 = w1.shape[1], w2.shape[1], w3.shape[1]
    D_out = w4.shape[1]

    grid = (pl.cdiv(B, block_m),)
    # NOTE: if block_m does not divide B, the final partial batch tile reads padded rows;
    # Pallas masks those rows on writeback so the visible result is exact.  Never consume
    # the padded intermediate rows directly.

    # Grid-invariant operands (constant index_map): Pallas keeps them resident and does
    # not re-DMA them per step.  They total ~25 KiB in bf16 -> not worth special-casing.
    full = lambda arr: pl.BlockSpec(arr.shape, lambda i: (0, 0))

    # Explicit VMEM budget (double-buffered x/out tiles + resident weights + f32 temps),
    # with headroom, clamped to a limit valid on v5e/v6e/v7x scoped VMEM.
    h_max = max(H1, H2, H3, D_out)
    weight_bytes = (D_in * H1 + H1 * H2 + H2 * H3 + H3 * D_out) * 2
    bias_bytes = (H1 + H2 + H3 + D_out) * 4
    vmem_need = (2 * block_m * D_in * 4            # x tile, 2 buffers, f32
                 + 2 * block_m * D_out * 4         # out tile, 2 buffers, f32
                 + 2 * (weight_bytes + bias_bytes)
                 + 6 * block_m * h_max * 4)        # in-flight f32/bf16 intermediates
    vmem_limit = int(min(max(2 * vmem_need, 4 << 20), 32 << 20))

    flops = 2 * B * (D_in * H1 + H1 * H2 + H2 * H3 + H3 * D_out)
    bytes_accessed = B * D_in * 4 + weight_bytes + bias_bytes + B * D_out * 4

    return pl.pallas_call(
        mlp_kernel,
        out_shape=jax.ShapeDtypeStruct((B, D_out), jnp.float32),
        grid_spec=pltpu.PrefetchScalarGridSpec(
            num_scalar_prefetch=0,
            grid=grid,
            in_specs=[
                pl.BlockSpec((block_m, D_in), lambda i: (i, 0)),   # x: tiled over batch
                full(w1), full(b1),
                full(w2), full(b2),
                full(w3), full(b3),
                full(w4), full(b4),
            ],
            # Last dim == full array dim, so the (8,128) rule is satisfied without padding.
            out_specs=pl.BlockSpec((block_m, D_out), lambda i: (i, 0)),
        ),
        compiler_params=pltpu.CompilerParams(
            dimension_semantics=("parallel",),      # batch axis -> shard across TCs on v7x
            vmem_limit_bytes=vmem_limit,
        ),
        cost_estimate=pl.CostEstimate(
            flops=flops,
            transcendentals=B * D_out,              # sigmoid epilogue
            bytes_accessed=bytes_accessed,
        ),
    )(x, w1, b1, w2, b2, w3, b3, w4, b4)


def make_model_forward(x, prepared_params, *, block_m=None):
    """Runs makeModel.forward as a single fused Pallas kernel.

    x: (B, input_shape) float32 (cast to bf16 for the MXU inside the kernel)
    prepared_params: output of prepare_params() -- bf16 (in, out) weights, f32 (1, out) biases.
    """
    if block_m is None:
        block_m = _choose_block_m(x.shape[0], _num_tensorcores())
    return _forward(x, prepared_params, block_m=int(block_m))


def init_params(key, input_shape, hidden_size, output_size):
    """Deterministic PyTorch-Linear-style (uniform +-1/sqrt(fan_in)) init.

    Weights are stored as (in_features, out_features) for x @ W + b.
    Biases are stored as (1, out_features) to keep them 2D for VMEM.
    """
    dims = [input_shape, hidden_size[0], hidden_size[1], hidden_size[2], output_size]
    params = {}
    for idx in range(4):
        fan_in, fan_out = dims[idx], dims[idx + 1]
        key, kw, kb = jax.random.split(key, 3)
        bound = 1.0 / jnp.sqrt(jnp.float32(fan_in))
        params[f"w{idx + 1}"] = jax.random.uniform(
            kw, (fan_in, fan_out), jnp.float32, -bound, bound)
        params[f"b{idx + 1}"] = jax.random.uniform(
            kb, (1, fan_out), jnp.float32, -bound, bound)
    return params


def reference_forward(x, params):
    """Plain-JAX f32 reference for correctness checking."""
    h = jnp.maximum(x @ params["w1"] + params["b1"], 0.0)
    h = jnp.maximum(h @ params["w2"] + params["b2"], 0.0)
    h = jnp.maximum(h @ params["w3"] + params["b3"], 0.0)
    return jax.nn.sigmoid(h @ params["w4"] + params["b4"])


if __name__ == "__main__":
    # Small shapes consistent with makeModel(input_shape, hidden_size, output_size)
    batch = 8
    input_shape = 32
    hidden_size = (64, 64, 32)
    output_size = 8

    key = jax.random.PRNGKey(0)
    key, kx = jax.random.split(key)
    x = jax.random.normal(kx, (batch, input_shape), dtype=jnp.float32)

    params = init_params(key, input_shape, hidden_size, output_size)
    prepared = prepare_params(params)        # one-time bf16/f32 conversion, outside jit

    out = make_model_forward(x, prepared)
    out = jax.block_until_ready(out)

    ref = reference_forward(x, params)
    assert out.shape == (batch, output_size), out.shape
    assert bool(jnp.all(jnp.isfinite(out))), "non-finite output"
    # bf16 MXU inputs with f32 accumulation vs pure-f32 reference -> loose-ish tolerance
    # (documented: downstream users comparing against an f32 implementation should expect
    # ~1e-2-level differences).
    assert jnp.allclose(out, ref, atol=2e-2, rtol=2e-2), \
        float(jnp.max(jnp.abs(out - ref)))

    print("KERNEL_OK")
</pallas_src>

<mosaic_0001>
module attributes {stable_mosaic.version = 11 : i64} {
  func.func @mlp_kernel(%arg0: i32, %arg1: memref<8x32xf32, #tpu.memory_space<vmem>>, %arg2: memref<32x64xbf16, #tpu.memory_space<vmem>>, %arg3: memref<1x64xf32, #tpu.memory_space<vmem>>, %arg4: memref<64x64xbf16, #tpu.memory_space<vmem>>, %arg5: memref<1x64xf32, #tpu.memory_space<vmem>>, %arg6: memref<64x32xbf16, #tpu.memory_space<vmem>>, %arg7: memref<1x32xf32, #tpu.memory_space<vmem>>, %arg8: memref<32x8xbf16, #tpu.memory_space<vmem>>, %arg9: memref<1x8xf32, #tpu.memory_space<vmem>>, %arg10: memref<8x8xf32, #tpu.memory_space<vmem>>) attributes {dimension_semantics = [#tpu.dimension_semantics<parallel>], iteration_bounds = array<i64: 1>, scalar_prefetch = 0 : i64, scratch_operands = 0 : i64, tpu.core_type = #tpu.core_type<tc>, window_params = [{transform_indices = @transform_0, window_bounds = array<i64: 8, 32>}, {pipeline_mode = #tpu.pipeline_mode<synchronous>, transform_indices = @transform_1, window_bounds = array<i64: 32, 64>}, {pipeline_mode = #tpu.pipeline_mode<synchronous>, transform_indices = @transform_2, window_bounds = array<i64: 1, 64>}, {pipeline_mode = #tpu.pipeline_mode<synchronous>, transform_indices = @transform_3, window_bounds = array<i64: 64, 64>}, {pipeline_mode = #tpu.pipeline_mode<synchronous>, transform_indices = @transform_4, window_bounds = array<i64: 1, 64>}, {pipeline_mode = #tpu.pipeline_mode<synchronous>, transform_indices = @transform_5, window_bounds = array<i64: 64, 32>}, {pipeline_mode = #tpu.pipeline_mode<synchronous>, transform_indices = @transform_6, window_bounds = array<i64: 1, 32>}, {pipeline_mode = #tpu.pipeline_mode<synchronous>, transform_indices = @transform_7, window_bounds = array<i64: 32, 8>}, {pipeline_mode = #tpu.pipeline_mode<synchronous>, transform_indices = @transform_8, window_bounds = array<i64: 1, 8>}, {transform_indices = @transform_9, window_bounds = array<i64: 8, 8>}]} {
    %c0 = arith.constant 0 : index
    %c0_0 = arith.constant 0 : index
    %0 = vector.load %arg1[%c0, %c0_0] : memref<8x32xf32, #tpu.memory_space<vmem>>, vector<8x32xf32>
    %1 = arith.truncf %0 : vector<8x32xf32> to vector<8x32xbf16>
    %c0_1 = arith.constant 0 : index
    %c0_2 = arith.constant 0 : index
    %2 = vector.load %arg2[%c0_1, %c0_2] : memref<32x64xbf16, #tpu.memory_space<vmem>>, vector<32x64xbf16>
    %cst = arith.constant dense<0.000000e+00> : vector<8x64xf32>
    %3 = tpu.matmul %1, %2, %cst {dimension_numbers = #tpu.dot_dimension_numbers<[1], [0], [0], [1], [0, 0, 1, 1], [], []>} : vector<8x32xbf16>, vector<32x64xbf16>, vector<8x64xf32> -> vector<8x64xf32>
    %c0_3 = arith.constant 0 : index
    %c0_4 = arith.constant 0 : index
    %4 = vector.load %arg3[%c0_3, %c0_4] : memref<1x64xf32, #tpu.memory_space<vmem>>, vector<1x64xf32>
    %5 = vector.broadcast %4 : vector<1x64xf32> to vector<8x64xf32>
    %6 = arith.addf %3, %5 : vector<8x64xf32>
    %cst_5 = arith.constant 0.000000e+00 : f32
    %7 = vector.broadcast %cst_5 : f32 to vector<8x64xf32>
    %8 = arith.maximumf %6, %7 : vector<8x64xf32>
    %9 = arith.truncf %8 : vector<8x64xf32> to vector<8x64xbf16>
    %c0_6 = arith.constant 0 : index
    %c0_7 = arith.constant 0 : index
    %10 = vector.load %arg4[%c0_6, %c0_7] : memref<64x64xbf16, #tpu.memory_space<vmem>>, vector<64x64xbf16>
    %cst_8 = arith.constant dense<0.000000e+00> : vector<8x64xf32>
    %11 = tpu.matmul %9, %10, %cst_8 {dimension_numbers = #tpu.dot_dimension_numbers<[1], [0], [0], [1], [0, 0, 1, 1], [], []>} : vector<8x64xbf16>, vector<64x64xbf16>, vector<8x64xf32> -> vector<8x64xf32>
    %c0_9 = arith.constant 0 : index
    %c0_10 = arith.constant 0 : index
    %12 = vector.load %arg5[%c0_9, %c0_10] : memref<1x64xf32, #tpu.memory_space<vmem>>, vector<1x64xf32>
    %13 = vector.broadcast %12 : vector<1x64xf32> to vector<8x64xf32>
    %14 = arith.addf %11, %13 : vector<8x64xf32>
    %cst_11 = arith.constant 0.000000e+00 : f32
    %15 = vector.broadcast %cst_11 : f32 to vector<8x64xf32>
    %16 = arith.maximumf %14, %15 : vector<8x64xf32>
    %17 = arith.truncf %16 : vector<8x64xf32> to vector<8x64xbf16>
    %c0_12 = arith.constant 0 : index
    %c0_13 = arith.constant 0 : index
    %18 = vector.load %arg6[%c0_12, %c0_13] : memref<64x32xbf16, #tpu.memory_space<vmem>>, vector<64x32xbf16>
    %cst_14 = arith.constant dense<0.000000e+00> : vector<8x32xf32>
    %19 = tpu.matmul %17, %18, %cst_14 {dimension_numbers = #tpu.dot_dimension_numbers<[1], [0], [0], [1], [0, 0, 1, 1], [], []>} : vector<8x64xbf16>, vector<64x32xbf16>, vector<8x32xf32> -> vector<8x32xf32>
    %c0_15 = arith.constant 0 : index
    %c0_16 = arith.constant 0 : index
    %20 = vector.load %arg7[%c0_15, %c0_16] : memref<1x32xf32, #tpu.memory_space<vmem>>, vector<1x32xf32>
    %21 = vector.broadcast %20 : vector<1x32xf32> to vector<8x32xf32>
    %22 = arith.addf %19, %21 : vector<8x32xf32>
    %cst_17 = arith.constant 0.000000e+00 : f32
    %23 = vector.broadcast %cst_17 : f32 to vector<8x32xf32>
    %24 = arith.maximumf %22, %23 : vector<8x32xf32>
    %25 = arith.truncf %24 : vector<8x32xf32> to vector<8x32xbf16>
    %c0_18 = arith.constant 0 : index
    %c0_19 = arith.constant 0 : index
    %26 = vector.load %arg8[%c0_18, %c0_19] : memref<32x8xbf16, #tpu.memory_space<vmem>>, vector<32x8xbf16>
    %cst_20 = arith.constant dense<0.000000e+00> : vector<8x8xf32>
    %27 = tpu.matmul %25, %26, %cst_20 {dimension_numbers = #tpu.dot_dimension_numbers<[1], [0], [0], [1], [0, 0, 1, 1], [], []>} : vector<8x32xbf16>, vector<32x8xbf16>, vector<8x8xf32> -> vector<8x8xf32>
    %c0_21 = arith.constant 0 : index
    %c0_22 = arith.constant 0 : index
    %28 = vector.load %arg9[%c0_21, %c0_22] : memref<1x8xf32, #tpu.memory_space<vmem>>, vector<1x8xf32>
    %29 = vector.broadcast %28 : vector<1x8xf32> to vector<8x8xf32>
    %30 = arith.addf %27, %29 : vector<8x8xf32>
    %31 = arith.negf %30 : vector<8x8xf32>
    %32 = math.exp %31 : vector<8x8xf32>
    %cst_23 = arith.constant 1.000000e+00 : f32
    %33 = vector.broadcast %cst_23 : f32 to vector<8x8xf32>
    %34 = arith.addf %33, %32 : vector<8x8xf32>
    %35 = arith.divf %33, %34 : vector<8x8xf32>
    %c0_24 = arith.constant 0 : index
    %c0_25 = arith.constant 0 : index
    %36 = vector.load %arg10[%c0_24, %c0_25] : memref<8x8xf32, #tpu.memory_space<vmem>>, vector<8x8xf32>
    tpu.vector_store %arg10[%c0_24, %c0_25], %35 {strides = array<i32>} : memref<8x8xf32, #tpu.memory_space<vmem>>, vector<8x8xf32>,
    return
  }
  func.func @transform_0(%arg0: i32) -> (i32, i32) {
    %c0_i32 = arith.constant 0 : i32
    %c0_i32_0 = arith.constant 0 : i32
    return %arg0, %c0_i32 : i32, i32
  }
  func.func @transform_1(%arg0: i32) -> (i32, i32) {
    %c0_i32 = arith.constant 0 : i32
    %c0_i32_0 = arith.constant 0 : i32
    %c0_i32_1 = arith.constant 0 : i32
    return %c0_i32, %c0_i32_0 : i32, i32
  }
  func.func @transform_2(%arg0: i32) -> (i32, i32) {
    %c0_i32 = arith.constant 0 : i32
    %c0_i32_0 = arith.constant 0 : i32
    %c0_i32_1 = arith.constant 0 : i32
    return %c0_i32, %c0_i32_0 : i32, i32
  }
  func.func @transform_3(%arg0: i32) -> (i32, i32) {
    %c0_i32 = arith.constant 0 : i32
    %c0_i32_0 = arith.constant 0 : i32
    %c0_i32_1 = arith.constant 0 : i32
    return %c0_i32, %c0_i32_0 : i32, i32
  }
  func.func @transform_4(%arg0: i32) -> (i32, i32) {
    %c0_i32 = arith.constant 0 : i32
    %c0_i32_0 = arith.constant 0 : i32
    %c0_i32_1 = arith.constant 0 : i32
    return %c0_i32, %c0_i32_0 : i32, i32
  }
  func.func @transform_5(%arg0: i32) -> (i32, i32) {
    %c0_i32 = arith.constant 0 : i32
    %c0_i32_0 = arith.constant 0 : i32
    %c0_i32_1 = arith.constant 0 : i32
    return %c0_i32, %c0_i32_0 : i32, i32
  }
  func.func @transform_6(%arg0: i32) -> (i32, i32) {
    %c0_i32 = arith.constant 0 : i32
    %c0_i32_0 = arith.constant 0 : i32
    %c0_i32_1 = arith.constant 0 : i32
    return %c0_i32, %c0_i32_0 : i32, i32
  }
  func.func @transform_7(%arg0: i32) -> (i32, i32) {
    %c0_i32 = arith.constant 0 : i32
    %c0_i32_0 = arith.constant 0 : i32
    %c0_i32_1 = arith.constant 0 : i32
    return %c0_i32, %c0_i32_0 : i32, i32
  }
  func.func @transform_8(%arg0: i32) -> (i32, i32) {
    %c0_i32 = arith.constant 0 : i32
    %c0_i32_0 = arith.constant 0 : i32
    %c0_i32_1 = arith.constant 0 : i32
    return %c0_i32, %c0_i32_0 : i32, i32
  }
  func.func @transform_9(%arg0: i32) -> (i32, i32) {
    %c0_i32 = arith.constant 0 : i32
    %c0_i32_0 = arith.constant 0 : i32
    return %arg0, %c0_i32 : i32, i32
  }
}

</mosaic_0001>

<bundles_post_ra>
// kernel: _forward.1
= control target key start
LH: loop header
LB: loop body
LE: loop exit
PB: predicated region body
PF: predicated region fallthrough
CT: control target
= control target key end

     0   :  { %14 = vsyncpa [#allocation3], 0  ;;  %s550_s0 = inlined_call_operand.vmem [shape: f32[8,32], index: 0, kind: input, shape index: {}]   ;;  %s551_s1 = inlined_call_operand.vmem [shape: bf16[32,64], index: 1, kind: input, shape index: {}]   ;;  %s552_s2 = inlined_call_operand.vmem [shape: f32[1,64], index: 2, kind: input, shape index: {}]   ;;  %s553_s3 = inlined_call_operand.vmem [shape: bf16[64,64], index: 3, kind: input, shape index: {}]   ;;  %s554_s4 = inlined_call_operand.vmem [shape: f32[1,64], index: 4, kind: input, shape index: {}]   ;;  %s555_s5 = inlined_call_operand.vmem [shape: bf16[64,32], index: 5, kind: input, shape index: {}]   ;;  %s556_s6 = inlined_call_operand.hbm [shape: f32[1,32], index: 6, kind: input, shape index: {}]   ;;  %s557_s7 = inlined_call_operand.vmem [shape: bf16[32,8], index: 7, kind: input, shape index: {}]   ;;  %s558_s8 = inlined_call_operand.hbm [shape: f32[1,8], index: 8, kind: input, shape index: {}]   ;;  %s559_s9 = inlined_call_operand.hbm [shape: f32[8,8], index: 9, kind: output, shape index: {}]  }
   0x1   :  { %15 = vsyncpa [#allocation6], 0 }
   0x2   :  { %16 = vsyncpa [#allocation4], 0  ;;  %s34_s11 = sshll.u32 %s556_s6, 4  ;;  %s441_s12 = smov [#allocation2]   ;;  %s35_s11 = int_to_ptr.hbm [resolvable:$true] %s34_s11 }
   0x3   :  { %s36_s13 = sshll.u32 %s441_s12, 4  ;;  %s47_s16 = sshll.u32 %s558_s8, 4  ;;  %s37_s13 = int_to_ptr.vmem [resolvable:$true] %s36_s13  ;;  %s48_s16 = int_to_ptr.hbm [resolvable:$true] %s47_s16 }
   0x4   :  { %39 = dma.hbm_to_vmem [thread:$0]  %s35_s11, 16, %s37_s13, [#allocation3]  }
   0x5   :  { %s442_s17 = smov [#allocation5]  }
   0x6   :  { %s49_s18 = sshll.u32 %s442_s17, 4  ;;  %s50_s18 = int_to_ptr.vmem [resolvable:$true] %s49_s18 }
   0x7   :  { %52 = dma.hbm_to_vmem [thread:$0]  %s48_s16, 16, %s50_s18, [#allocation6]  }
   0x8   :  { %435 = dma.done.wait [#allocation3], 16  }
   0x9   :  { %436 = vsyncadd [#allocation3], 4294967280 }
   0xa   :  { %437 = dma.done.wait [#allocation6], 16  }
   0xb   :  { %438 = vsyncadd [#allocation6], 4294967280  ;;  %v341_v0 = vld [vmem:[%s551_s1 + $0x8] sm:$0xff]  ;;  %v340_v1 = vld [vmem:[%s551_s1] sm:$0xff]  ;;  %vm84_vm0 = vcmask 261120   ;;  %vm139_vm1 = vcmask 523264  }
   0xc   :  { %v345_v2 = vld [vmem:[%s553_s3 + $0x18] sm:$0xff]  ;;  %94 = vmatpush.bf16.msra.mxu0 %v341_v0  ;;  %v62_v3 = vld [vmem:[%s550_s0] sm:$0xff]  ;;  %v344_v4 = vld [vmem:[%s553_s3 + $0x10] sm:$0xff]  ;;  %s276_s22 = sshll.u32 %s559_s9, 4  ;;  %vm267_vm5 = vcmask 64512   ;;  %s277_s22 = int_to_ptr.hbm [resolvable:$true] %s276_s22 }
   0xd   :  { %147 = vmatpush.bf16.msra.mxu1 %v345_v2  ;;  %v63_v5 = vpack.c.bf16 %v62_v3, %v62_v3  ;;  %v343_v6 = vld [vmem:[%s553_s3 + $0x8] sm:$0xff]  ;;  %v342_v7 = vld [vmem:[%s553_s3] sm:$0xff]  ;;  %v349_v8 = vld [vmem:[%s555_s5 + $0x18] sm:$0xff] }
   0xe   :  { %201 = vmatpush.bf16.msra.mxu2 %v349_v8  ;;  %v348_v9 = vld [vmem:[%s555_s5 + $0x10] sm:$0xff]  ;;  %v355_v10 = vld [vmem:[%s552_s2] ss:$0 sm:$0xff]  ;;  %v347_v16 = vld [vmem:[%s555_s5 + $0x8] sm:$0xff] }
   0xf   :  { %v346_v17 = vld [vmem:[%s555_s5] sm:$0xff]  ;;  %v351_v24 = vld [vmem:[%s557_s7 + $0x8] sm:$0xff] }
  0x10   :  { %95 = vmatpush.bf16.msra.mxu0 %v340_v1  ;;  %v356_v18 = vld [vmem:[%s554_s4] ss:$0 sm:$0xff]  ;;  %241 = vmatpush.bf16.msra.mxu3 %v351_v24  ;;  %v358_v32 = vld [vmem:[#allocation5] ss:$0 sm:$0xff]  ;;  %s443_s4 = smov [#allocation7]  }
  0x11   :  { %148 = vmatpush.bf16.msra.mxu1 %v344_v4  ;;  %v350_v25 = vld [vmem:[%s557_s7] sm:$0xff]  ;;  %s274_s5 = sshll.u32 %s443_s4, 4  ;;  %s275_s5 = int_to_ptr.vmem [resolvable:$true] %s274_s5 }
  0x12   :  { %202 = vmatpush.bf16.msra.mxu2 %v348_v9  ;;  %v357_v26 = vld [vmem:[#allocation2] ss:$0 sm:$0xff] }
  0x13   :  { %295 = vmatmul.msk.bf16.vlgmr.msra.gmra.mxu0 %vm84_vm0, %v63_v5 }
  0x14   :  { %242 = vmatpush.bf16.msra.mxu3 %v350_v25 }
  0x15   :  { %149 = vmatpush.bf16.msra.mxu1 %v343_v6 }
  0x16   :  { %203 = vmatpush.bf16.msra.mxu2 %v347_v16 }
  0x19   :  { %150 = vmatpush.bf16.msra.mxu1 %v342_v7 }
  0x1a   :  { %204 = vmatpush.bf16.msra.mxu2 %v346_v17 }
  0x90   :  { %v97_v11 = vpop.f32.mrf.mxu0 }
  0x91   :  { %v98_v12 = vadd.f32 %v355_v10, %v97_v11 }
  0x93   :  { %v101_v13 = vmax.f32 %v98_v12, 0.0 }
  0x95   :  { %v102_v14 = vpack.c.bf16 %v101_v13, %v101_v13 }
  0x97   :  { %312 = vmatmul.msk.bf16.vlgmr.msra.gmra.mxu1 %vm139_vm1, %v102_v14 }
  0x98   :  { %v99_v15 = vpop.f32.mrf.mxu0 }
 0x114   :  { %v152_v19 = vpop.f32.mrf.mxu1 }
 0x115   :  { %v153_v20 = vadd.f32 %v356_v18, %v152_v19 }
 0x117   :  { %v156_v21 = vmax.f32 %v153_v20, 0.0 }
 0x119   :  { %v157_v22 = vpack.c.bf16 %v156_v21, %v156_v21 }
 0x11b   :  { %329 = vmatmul.msk.bf16.vlgmr.msra.gmra.mxu2 %vm139_vm1, %v157_v22 }
 0x11c   :  { %v154_v23 = vpop.f32.mrf.mxu1 }
 0x19e   :  { %v206_v27 = vpop.f32.mrf.mxu2 }
 0x19f   :  { %v207_v28 = vadd.f32 %v357_v26, %v206_v27 }
 0x1a1   :  { %v210_v29 = vmax.f32 %v207_v28, 0.0 }
 0x1a3   :  { %v211_v30 = vpack.c.bf16 %v210_v29, %v210_v29 }
 0x1a5   :  { %338 = vmatmul.msk.bf16.vlgmr.msra.gmra.mxu3 %vm84_vm0, %v211_v30 }
 0x1a6   :  { %v208_v31 = vpop.f32.mrf.mxu2 }
 0x228   :  { %v244_v33 = vpop.f32.mrf.mxu3 }
 0x229   :  { %v245_v34 = vadd.f32 %v358_v32, %v244_v33 }
 0x22b   :  { %v339_v35 = vmul.f32 -1.442695, %v245_v34 }
 0x22d   :  { %359 = vpow2.f32 %v339_v35 }
 0x230   :  { %v246_v36 = vpop.f32.mrf.mxu3 }
 0x233   :  { %v360_v37 = vpop.eup %359 }
 0x234   :  { %v251_v38 = vadd.f32 1.0, %v360_v37 }
 0x236   :  { %361 = vrcp.f32 %v251_v38  ;;  %v263_v42 = vand.u32 2147483648, %v251_v38  ;;  %v261_v44 = vand.u32 2147483647, %v251_v38  ;;  %vm257_vm3 = vweird.f32 %v251_v38 }
 0x238   :  { %v264_v46 = vor.u32 1.1754944e-38, %v263_v42  ;;  %vm262_vm6 = vcmp.eq.f32.partialorder %v261_v44, 8.507059e+37 }
 0x23c   :  { %v362_v39 = vpop.eup %361 }
 0x23d   :  { %v253_v40 = vmul.f32 %v362_v39, %v251_v38  ;;  %vm258_vm2 = vweird.f32 %v362_v39 }
 0x23e   :  { %vm259_vm4 = vmor %vm257_vm3, %vm258_vm2 }
 0x23f   :  { %v254_v41 = vsub.f32 1.0, %v253_v40 }
 0x241   :  { %v255_v43 = vmul.f32 %v362_v39, %v254_v41 }
 0x243   :  { %v256_v45 = vadd.f32 %v362_v39, %v255_v43 }
 0x245   :  { %v260_v47 = vsel %vm259_vm4, %v362_v39, %v256_v45 }
 0x246   :  { %v265_v48 = vsel %vm262_vm6, %v264_v46, %v260_v47 }
 0x247   :  { %268 = vst.msk [vmem:[#allocation7] sm:$0xff] %vm267_vm5, %v265_v48 }
 0x248   :  { %279 = dma.vmem_to_hbm [thread:$0]  %s275_s5, 128, %s277_s22, [#allocation4]  }
 0x249   :  { %439 = dma.done.wait [#allocation4], 128  }
 0x24a   :  { %440 = vsyncadd [#allocation4], 4294967168 }
 0x24b   :  { %284 = vsyncpa [#allocation3], 1 }
 0x24c   :  { %285 = vsyncpa [#allocation6], 1 }
 0x24d   :  { %286 = vsyncpa [#allocation4], 1 }

</bundles_post_ra>
